<compile_context>
chip_gen: v7x
topology: tpu7x:2x2x1
jax: 0.10.0
libtpu: 0.0.40
codegen_flags: <defaults>
</compile_context>

<pallas_src>
import jax
import jax.numpy as jnp
from jax.experimental import pallas as pl
from jax.experimental.pallas import tpu as pltpu

_LANE = 128
_NATIVE_COMPUTE_DTYPES = (jnp.dtype(jnp.float32), jnp.dtype(jnp.bfloat16))


def _h_swish_kernel(x_ref, o_ref):
    x = x_ref[...]
    # bf16 / f32 compute natively (v6e/v7x have bf16 VALU); everything else
    # goes through f32.
    xc = x if jnp.dtype(x.dtype) in _NATIVE_COMPUTE_DTYPES else x.astype(jnp.float32)
    # x * relu6(x + 3) / 6   (multiply by 1/6 instead of divide)
    y = xc * (jnp.clip(xc + 3.0, 0.0, 6.0) * (1.0 / 6.0))
    o_ref[...] = y.astype(o_ref.dtype)


def _round_up(a, b):
    return ((a + b - 1) // b) * b


def _sublane_multiple(dtype):
    # f32 -> 8, bf16/f16 -> 16, int8/fp8 -> 32 (packed-sublane layouts).
    return 8 * max(1, 4 // jnp.dtype(dtype).itemsize)


def _target_block_bytes():
    # v5e (and older) scoped-VMEM default is only 16 MiB -> keep 2 MiB blocks;
    # v6e/v7x (32 MiB scoped default) take 4 MiB blocks for lower per-step
    # overhead (~0.35 us per grid step).
    try:
        kind = jax.devices()[0].device_kind.lower()
    except Exception:  # pragma: no cover - e.g. interpret mode on CPU
        kind = ""
    if any(v in kind for v in ("v2", "v3", "v4", "v5")):
        return 2 * 1024 * 1024
    return 4 * 1024 * 1024


def _pick_cols(n):
    # Largest lane-dense width that divides the flat size (free reshape).
    for c in (2048, 1024, 512, 256, 128):
        if n % c == 0:
            return c
    return None


def h_swish_pallas(x):
    """Elementwise h_swish on an arbitrarily shaped array via one Pallas kernel."""
    shape, dtype = x.shape, x.dtype
    n = int(x.size)
    if n == 0:
        return x

    itemsize = jnp.dtype(dtype).itemsize
    sub = _sublane_multiple(dtype)

    cols = _pick_cols(n)
    if cols is not None:
        # Lane-dense fast path: free reshape, unmasked full-lane stores.
        rows = n // cols
        x2d = x.reshape(rows, cols)
    else:
        # Ragged total size: keep the original trailing dim as the (full-extent)
        # lane dim and tile the collapsed leading dims.  No pad, no slice, no
        # extra HBM round trips; stores on the narrow lane dim are masked but
        # total HBM traffic stays at 1 read + 1 write.
        last = shape[-1] if len(shape) else 1
        cols = max(int(last), 1)
        rows = n // cols
        x2d = x.reshape(rows, cols)

    padded_cols = _round_up(cols, _LANE)  # VMEM cost of a row (lane padding)
    block_bytes = _target_block_bytes()
    max_tile_rows = max(sub, (block_bytes // (padded_cols * itemsize)) // sub * sub)
    # Guarantee >=2 grid steps whenever possible so both v7x TensorCores work.
    half_rows = _round_up(pl.cdiv(rows, 2), sub)
    tile_rows = min(max_tile_rows, half_rows)
    if tile_rows >= rows:
        tile_rows = rows  # single full-extent block (small input)

    if tile_rows * padded_cols * itemsize > 16 * 1024 * 1024:
        # TODO(synk): pathological ragged shape (huge trailing dim with no 128
        # factor anywhere); fall back to plain XLA rather than risk a VMEM OOM.
        xf = x.astype(jnp.float32)
        return (xf * jnp.clip(xf + 3.0, 0.0, 6.0) * (1.0 / 6.0)).astype(dtype)

    out2d = pl.pallas_call(
        _h_swish_kernel,
        grid=(pl.cdiv(rows, tile_rows),),
        in_specs=[pl.BlockSpec((tile_rows, cols), lambda i: (i, 0))],
        out_specs=pl.BlockSpec((tile_rows, cols), lambda i: (i, 0)),
        out_shape=jax.ShapeDtypeStruct((rows, cols), dtype),
        compiler_params=pltpu.CompilerParams(
            dimension_semantics=("parallel",)),
        cost_estimate=pl.CostEstimate(
            flops=5 * n,
            transcendentals=0,
            bytes_accessed=2 * n * itemsize),
    )(x2d)

    return out2d.reshape(shape)


def h_swish_reference(x):
    xf = x.astype(jnp.float32)
    return (xf * jnp.clip(xf + 3.0, 0.0, 6.0) / 6.0).astype(x.dtype)


if __name__ == "__main__":
    key = jax.random.PRNGKey(0)
    # Small NCHW-style input consistent with how h_swish is used in MobileNetV3.
    x = jax.random.normal(key, (2, 4, 16, 16), jnp.float32) * 4.0

    fwd = jax.jit(h_swish_pallas)
    y = jax.block_until_ready(fwd(x))
    y_ref = h_swish_reference(x)
    assert y.shape == x.shape, y.shape
    max_err = float(jnp.max(jnp.abs(y - y_ref)))
    assert jnp.allclose(y, y_ref, atol=1e-5, rtol=1e-5), max_err

    # Ragged flat size (3*7*33*33 has no factor of 128): exercises the
    # no-pad fallback path (trailing dim as full-extent lane dim).
    x2 = jax.random.normal(jax.random.PRNGKey(1), (3, 7, 33, 33), jnp.float32) * 4.0
    y2 = jax.block_until_ready(fwd(x2))
    assert jnp.allclose(y2, h_swish_reference(x2), atol=1e-5, rtol=1e-5)

    # bf16 input: computed natively in bf16 inside the kernel.
    x3 = (jax.random.normal(jax.random.PRNGKey(2), (2, 16, 32, 32), jnp.float32)
          * 4.0).astype(jnp.bfloat16)
    y3 = jax.block_until_ready(fwd(x3))
    ref3 = h_swish_reference(x3).astype(jnp.float32)
    assert jnp.allclose(y3.astype(jnp.float32), ref3, atol=5e-2, rtol=5e-2)

    print("KERNEL_OK")
</pallas_src>

<mosaic_0001>
module attributes {stable_mosaic.version = 11 : i64} {
  func.func @_h_swish_kernel(%arg0: i32, %arg1: memref<1x2048xf32, #tpu.memory_space<vmem>>, %arg2: memref<1x2048xf32, #tpu.memory_space<vmem>>) attributes {dimension_semantics = [#tpu.dimension_semantics<parallel>], iteration_bounds = array<i64: 1>, scalar_prefetch = 0 : i64, scratch_operands = 0 : i64, tpu.core_type = #tpu.core_type<tc>, window_params = [{transform_indices = @transform_0, window_bounds = array<i64: 1, 2048>}, {transform_indices = @transform_1, window_bounds = array<i64: 1, 2048>}]} {
    %c0 = arith.constant 0 : index
    %c0_0 = arith.constant 0 : index
    %0 = vector.load %arg1[%c0, %c0_0] : memref<1x2048xf32, #tpu.memory_space<vmem>>, vector<1x2048xf32>
    %cst = arith.constant 3.000000e+00 : f32
    %1 = vector.broadcast %cst : f32 to vector<1x2048xf32>
    %2 = arith.addf %0, %1 : vector<1x2048xf32>
    %cst_1 = arith.constant 0.000000e+00 : f32
    %cst_2 = arith.constant 6.000000e+00 : f32
    %3 = vector.broadcast %cst_1 : f32 to vector<1x2048xf32>
    %4 = arith.maximumf %3, %2 : vector<1x2048xf32>
    %5 = vector.broadcast %cst_2 : f32 to vector<1x2048xf32>
    %6 = arith.minimumf %5, %4 : vector<1x2048xf32>
    %cst_3 = arith.constant 0.166666672 : f32
    %7 = vector.broadcast %cst_3 : f32 to vector<1x2048xf32>
    %8 = arith.mulf %6, %7 : vector<1x2048xf32>
    %9 = arith.mulf %0, %8 : vector<1x2048xf32>
    %c0_4 = arith.constant 0 : index
    %c0_5 = arith.constant 0 : index
    %10 = vector.load %arg2[%c0_4, %c0_5] : memref<1x2048xf32, #tpu.memory_space<vmem>>, vector<1x2048xf32>
    tpu.vector_store %arg2[%c0_4, %c0_5], %9 {strides = array<i32>} : memref<1x2048xf32, #tpu.memory_space<vmem>>, vector<1x2048xf32>,
    return
  }
  func.func @transform_0(%arg0: i32) -> (i32, i32) {
    %c0_i32 = arith.constant 0 : i32
    %c0_i32_0 = arith.constant 0 : i32
    return %arg0, %c0_i32 : i32, i32
  }
  func.func @transform_1(%arg0: i32) -> (i32, i32) {
    %c0_i32 = arith.constant 0 : i32
    %c0_i32_0 = arith.constant 0 : i32
    return %arg0, %c0_i32 : i32, i32
  }
}

</mosaic_0001>

<bundles_post_ra>
// kernel: h_swish_pallas.1
= control target key start
LH: loop header
LB: loop body
LE: loop exit
PB: predicated region body
PF: predicated region fallthrough
CT: control target
= control target key end

     0   :  { %s48_s0 = inlined_call_operand.vmem [shape: f32[1,2048], index: 0, kind: input, shape index: {}]   ;;  %s49_s1 = inlined_call_operand.vmem [shape: f32[1,2048], index: 1, kind: output, shape index: {}]  }
   0x1   :  { %v8_v0 = vld [vmem:[%s48_s0] sm:$0xff]  ;;  %v9_v1 = vld [vmem:[%s48_s0 + $0x8] sm:$0xff] }
   0x2   :  { %v10_v2 = vadd.f32 3.0, %v8_v0  ;;  %v11_v3 = vadd.f32 3.0, %v9_v1 }
   0x4   :  { %v12_v4 = vmax.f32 %v10_v2, 0.0  ;;  %v13_v5 = vmax.f32 %v11_v3, 0.0 }
   0x6   :  { %v14_v6 = vmin.f32 %v12_v4, 6.0  ;;  %v15_v7 = vmin.f32 %v13_v5, 6.0 }
   0x8   :  { %v16_v8 = vmul.f32 0.16666667, %v14_v6  ;;  %v17_v9 = vmul.f32 0.16666667, %v15_v7 }
   0xa   :  { %v18_v10 = vmul.f32 %v16_v8, %v8_v0  ;;  %v19_v11 = vmul.f32 %v17_v9, %v9_v1 }
   0xc   :  { %20 = vst [vmem:[%s49_s1] sm:$0xff] %v18_v10  ;;  %21 = vst [vmem:[%s49_s1 + $0x8] sm:$0xff] %v19_v11 }

</bundles_post_ra>
